<compile_context>
chip_gen: v7x
topology: tpu7x:2x2x1
jax: 0.10.0
libtpu: 0.0.40
codegen_flags: <defaults>
</compile_context>

<pallas_src>
import functools

import jax
import jax.numpy as jnp
from jax.experimental import pallas as pl
from jax.experimental.pallas import tpu as pltpu


def _normalize_kernel(x_ref, mul_ref, sub_ref, o_ref, *, row_block):
    # x_ref:   (row_block, col_block)  current tile, original input dtype
    # mul_ref: (rows_pad, 1)           resident per-row scale, f32
    # sub_ref: (rows_pad, 1)           resident per-row shift, f32
    # o_ref:   (row_block, col_block)  output tile, compute dtype
    i = pl.program_id(0)
    start = pl.multiple_of(i * row_block, row_block)
    mul = mul_ref[pl.ds(start, row_block), :]
    sub = sub_ref[pl.ds(start, row_block), :]

    x = x_ref[...]
    if jnp.issubdtype(x_ref.dtype, jnp.integer):
        # Widen integer (e.g. uint8 image) to i32 first, then to f32.
        x = x.astype(jnp.int32)
    x = x.astype(jnp.float32)

    # Arithmetic in f32; only the final store is in the output dtype.
    o_ref[...] = (x * mul - sub).astype(o_ref.dtype)


def _sublane_multiple(dtype):
    # f32 -> 8 rows per vreg sublane group, bf16/f16 -> 16, 8-bit -> 32.
    bits = jnp.dtype(dtype).itemsize * 8
    return max(8, 256 // bits)


def _tile_sizes(rows, hw, in_bytes, out_bytes, row_align):
    """Pick (row_block, col_block) targeting ~8 MiB of (in + out) bytes per block."""
    lane = 128
    block_budget = 8 * 1024 * 1024  # in + out bytes for ONE block (x2 for dbl-buffer)
    bpe = in_bytes + out_bytes

    # Column (lane) axis: keep the full H*W when it fits alongside a minimal
    # row block; otherwise take a 128-aligned chunk sized to the budget.
    if hw * row_align * bpe <= block_budget or hw <= lane:
        col_block = hw
    else:
        col_block = (block_budget // (row_align * bpe)) // lane * lane
        col_block = max(lane, min(col_block, (hw // lane) * lane))
    n_col_tiles = pl.cdiv(hw, col_block)

    # Row (sublane) axis: fill the remaining budget, but prefer >= ~8 total
    # grid steps when there is enough work (pipelining + megacore sharding).
    bytes_per_row = col_block * bpe
    max_rb = max(row_align, (block_budget // bytes_per_row) // row_align * row_align)
    want_row_tiles = max(1, 8 // n_col_tiles)
    target_rb = pl.cdiv(pl.cdiv(rows, want_row_tiles), row_align) * row_align
    row_block = min(max_rb, max(row_align, target_rb))
    row_block = min(row_block, pl.cdiv(rows, row_align) * row_align)
    return row_block, col_block


def normalize_input(img, mean, std, output_cast=None):
    """img: (N, C, H, W), any dtype (e.g. uint8 or float32). mean/std: length-C."""
    if output_cast == "half":
        # PyTorch .half() is fp16; bf16 is the TPU-native half precision.
        compute_dtype = jnp.bfloat16
    elif output_cast == "full":
        compute_dtype = jnp.float32
    else:
        compute_dtype = jnp.promote_types(img.dtype, jnp.float32)

    n, c, h, w = img.shape
    rows, hw = n * c, h * w

    # Per-channel constants computed in f32 for precision, expanded to one
    # value per (n, c) row.
    mean32 = jnp.asarray(mean, dtype=jnp.float32)
    std32 = jnp.asarray(std, dtype=jnp.float32)
    mul = 1.0 / (255.0 * std32)  # (C,)
    sub = mean32 / std32         # (C,)

    # ---- tile sizing -------------------------------------------------------
    in_bytes = jnp.dtype(img.dtype).itemsize
    out_bytes = jnp.dtype(compute_dtype).itemsize
    row_align = max(_sublane_multiple(img.dtype), _sublane_multiple(compute_dtype))
    row_block, col_block = _tile_sizes(rows, hw, in_bytes, out_bytes, row_align)

    rows_pad = pl.cdiv(rows, row_block) * row_block
    grid = (rows_pad // row_block, pl.cdiv(hw, col_block))

    # ---- operands ----------------------------------------------------------
    x2d = img.reshape(rows, hw)  # free: contiguous reshape
    if rows_pad != rows:
        # TODO(synk): switch to Pallas boundary masking (no wrapper pad copy)
        # for misaligned row counts with very large images; typical CNN inputs
        # (N*C a multiple of 8/32) never take this branch.
        x2d = jnp.pad(x2d, ((0, rows_pad - rows), (0, 0)))
    row_chan = jnp.arange(rows_pad, dtype=jnp.int32) % c
    mul_rows = mul[row_chan].reshape(rows_pad, 1)
    sub_rows = sub[row_chan].reshape(rows_pad, 1)

    out2d = pl.pallas_call(
        functools.partial(_normalize_kernel, row_block=row_block),
        out_shape=jax.ShapeDtypeStruct((rows_pad, hw), compute_dtype),
        grid_spec=pltpu.PrefetchScalarGridSpec(
            num_scalar_prefetch=0,
            grid=grid,
            in_specs=[
                pl.BlockSpec((row_block, col_block), lambda i, j: (i, j)),
                pl.BlockSpec((rows_pad, 1), lambda i, j: (0, 0)),  # resident, one DMA
                pl.BlockSpec((rows_pad, 1), lambda i, j: (0, 0)),  # resident, one DMA
            ],
            out_specs=pl.BlockSpec((row_block, col_block), lambda i, j: (i, j)),
        ),
        compiler_params=pltpu.CompilerParams(
            dimension_semantics=("parallel", "parallel"),
            vmem_limit_bytes=40 * 1024 * 1024,
        ),
    )(x2d, mul_rows, sub_rows)

    if rows_pad != rows:
        out2d = out2d[:rows]
    normalized = out2d.reshape(n, c, h, w)
    # Inner `model` is the identity here (see TODO at top of file).
    return normalized


def _reference(img, mean, std, output_cast=None):
    mean32 = jnp.asarray(mean, dtype=jnp.float32)
    std32 = jnp.asarray(std, dtype=jnp.float32)
    mul = (1.0 / (255.0 * std32)).reshape(1, -1, 1, 1)
    sub = (mean32 / std32).reshape(1, -1, 1, 1)
    if output_cast == "half":
        out_dtype = jnp.bfloat16
    elif output_cast == "full":
        out_dtype = jnp.float32
    else:
        out_dtype = jnp.promote_types(img.dtype, jnp.float32)
    return (img.astype(jnp.float32) * mul - sub).astype(out_dtype)


if __name__ == "__main__":
    key = jax.random.PRNGKey(0)
    N, C, H, W = 2, 4, 16, 16
    mean = [0.485, 0.456, 0.406, 0.400]
    std = [0.229, 0.224, 0.225, 0.230]

    # 1) float32 input, output_cast='full'.
    img_f32 = jax.random.uniform(key, (N, C, H, W), dtype=jnp.float32) * 255.0
    out_full = jax.block_until_ready(normalize_input(img_f32, mean, std, "full"))
    ref_full = _reference(img_f32, mean, std, "full")
    assert out_full.shape == (N, C, H, W)
    assert out_full.dtype == jnp.float32
    assert jnp.allclose(out_full, ref_full, atol=1e-5, rtol=1e-5)

    # 2) uint8 input, output_cast=None -> cast to f32 happens inside the kernel.
    img_u8 = jax.random.randint(key, (N, C, H, W), 0, 256, dtype=jnp.int32).astype(jnp.uint8)
    out_u8 = jax.block_until_ready(normalize_input(img_u8, mean, std, None))
    ref_u8 = _reference(img_u8, mean, std, None)
    assert out_u8.dtype == jnp.float32
    assert jnp.allclose(out_u8, ref_u8, atol=1e-5, rtol=1e-5)

    # 3) float32 input, output_cast='half' (bf16 on TPU; fp16 has no native path).
    out_half = jax.block_until_ready(normalize_input(img_f32, mean, std, "half"))
    ref_half = _reference(img_f32, mean, std, "half")
    assert out_half.dtype == jnp.bfloat16
    assert jnp.allclose(out_half.astype(jnp.float32),
                        ref_half.astype(jnp.float32), atol=5e-2, rtol=5e-2)

    print("KERNEL_OK")
</pallas_src>

<mosaic_0001>
module attributes {stable_mosaic.version = 11 : i64} {
  func.func @_normalize_kernel(%arg0: i32, %arg1: i32, %arg2: memref<8x256xf32, #tpu.memory_space<vmem>>, %arg3: memref<8x1xf32, #tpu.memory_space<vmem>>, %arg4: memref<8x1xf32, #tpu.memory_space<vmem>>, %arg5: memref<8x256xf32, #tpu.memory_space<vmem>>) attributes {dimension_semantics = [#tpu.dimension_semantics<parallel>, #tpu.dimension_semantics<parallel>], iteration_bounds = array<i64: 1, 1>, scalar_prefetch = 0 : i64, scratch_operands = 0 : i64, tpu.core_type = #tpu.core_type<tc>, window_params = [{transform_indices = @transform_0, window_bounds = array<i64: 8, 256>}, {pipeline_mode = #tpu.pipeline_mode<synchronous>, transform_indices = @transform_1, window_bounds = array<i64: 8, 1>}, {pipeline_mode = #tpu.pipeline_mode<synchronous>, transform_indices = @transform_2, window_bounds = array<i64: 8, 1>}, {transform_indices = @transform_3, window_bounds = array<i64: 8, 256>}]} {
    %c8_i32 = arith.constant 8 : i32
    %0 = arith.muli %arg0, %c8_i32 : i32
    %1 = tpu.assume_multiple %0, 8 : i32
    %2 = arith.index_cast %1 : i32 to index
    %c0 = arith.constant 0 : index
    %3 = vector.load %arg3[%2, %c0] : memref<8x1xf32, #tpu.memory_space<vmem>>, vector<8x1xf32>
    %4 = arith.index_cast %1 : i32 to index
    %c0_0 = arith.constant 0 : index
    %5 = vector.load %arg4[%4, %c0_0] : memref<8x1xf32, #tpu.memory_space<vmem>>, vector<8x1xf32>
    %c0_1 = arith.constant 0 : index
    %c0_2 = arith.constant 0 : index
    %6 = vector.load %arg2[%c0_1, %c0_2] : memref<8x256xf32, #tpu.memory_space<vmem>>, vector<8x256xf32>
    %7 = vector.broadcast %3 : vector<8x1xf32> to vector<8x256xf32>
    %8 = arith.mulf %6, %7 : vector<8x256xf32>
    %9 = vector.broadcast %5 : vector<8x1xf32> to vector<8x256xf32>
    %10 = arith.subf %8, %9 : vector<8x256xf32>
    %c0_3 = arith.constant 0 : index
    %c0_4 = arith.constant 0 : index
    %11 = vector.load %arg5[%c0_3, %c0_4] : memref<8x256xf32, #tpu.memory_space<vmem>>, vector<8x256xf32>
    tpu.vector_store %arg5[%c0_3, %c0_4], %10 {strides = array<i32>} : memref<8x256xf32, #tpu.memory_space<vmem>>, vector<8x256xf32>,
    return
  }
  func.func @transform_0(%arg0: i32, %arg1: i32) -> (i32, i32) {
    %c0_i32 = arith.constant 0 : i32
    return %arg0, %arg1 : i32, i32
  }
  func.func @transform_1(%arg0: i32, %arg1: i32) -> (i32, i32) {
    %c0_i32 = arith.constant 0 : i32
    %c0_i32_0 = arith.constant 0 : i32
    %c0_i32_1 = arith.constant 0 : i32
    return %c0_i32, %c0_i32_0 : i32, i32
  }
  func.func @transform_2(%arg0: i32, %arg1: i32) -> (i32, i32) {
    %c0_i32 = arith.constant 0 : i32
    %c0_i32_0 = arith.constant 0 : i32
    %c0_i32_1 = arith.constant 0 : i32
    return %c0_i32, %c0_i32_0 : i32, i32
  }
  func.func @transform_3(%arg0: i32, %arg1: i32) -> (i32, i32) {
    %c0_i32 = arith.constant 0 : i32
    return %arg0, %arg1 : i32, i32
  }
}

</mosaic_0001>

<bundles_post_ra>
// kernel: tpu_custom_call.1
= control target key start
LH: loop header
LB: loop body
LE: loop exit
PB: predicated region body
PF: predicated region fallthrough
CT: control target
= control target key end

     0   :  { %v79_v1 = vmov 0   ;;  %s125_s0 = inlined_call_operand.vmem [shape: f32[8,256], index: 0, kind: input, shape index: {}]   ;;  %s126_s1 = inlined_call_operand.vmem [shape: f32[8,1], index: 1, kind: input, shape index: {}]   ;;  %s127_s2 = inlined_call_operand.vmem [shape: f32[8,1], index: 2, kind: input, shape index: {}]   ;;  %s128_s3 = inlined_call_operand.hbm [shape: f32[8,256], index: 3, kind: output, shape index: {}]  }
   0x1   :  { %v17_v0 = vld [vmem:[%s126_s1] sm:$0xff]  ;;  %54 = vset.pattern.permute.xlu0 %v79_v1 }
   0x2   :  { %8 = vsyncpa [#allocation3], 0  ;;  %24 = vperm.xlu0 %54, %v17_v0   ;;  %v19_v2 = vld [vmem:[%s127_s2] sm:$0xff]  ;;  %v21_v4 = vld [vmem:[%s125_s0 + $0x8] sm:$0xff]  ;;  %s80_s20 = smov [#allocation2]  }
   0x3   :  { %v20_v3 = vld [vmem:[%s125_s0] sm:$0xff]  ;;  %s44_s1 = sshll.u32 %s80_s20, 4  ;;  %s45_s1 = int_to_ptr.vmem [resolvable:$true] %s44_s1 }
   0x4   :  { %s55_s2 = scalar_lea.vmem %s45_s1, 256  ;;  %p60_p1 = scmp.lt.s32.totalorder %s45_s1, %s45_s1 }
   0x5   :  { %p56_p0 = scmp.ne.s32.totalorder %s45_s1, %s55_s2  ;;  %p61_p2 = scmp.lt.s32.totalorder %s55_s2, %s55_s2 }
   0x6   :  { %31 = vperm.xlu0 %54, %v19_v2  }
   0x7   :  { %p62_p3 = por %p61_p2, %p60_p1 }
   0x9   :  { %p63_p4 = pnand %p62_p3, %p56_p0 }
  0x81   :  { %v25_v5 = vpop.permute.xlu0 %24 }
  0x82   :  { %v27_v6 = vmul.f32 %v25_v5, %v20_v3  ;;  %v28_v7 = vmul.f32 %v25_v5, %v21_v4 }
  0x85   :  { %v32_v8 = vpop.permute.xlu0 %31 }
  0x86   :  { %v34_v9 = vsub.f32 %v27_v6, %v32_v8  ;;  %v35_v10 = vsub.f32 %v28_v7, %v32_v8 }
  0x88   :  { %36 = vst [vmem:[#allocation2] sm:$0xff] %v34_v9  ;;  %37 = vst [vmem:[#allocation2 + $0x8] sm:$0xff] %v35_v10 }
  0x89   :  { %66 = shalt.err (!%p63_p4)
}
  0x8a   :  { %s67_s22 = scalar_lea.hbm %s128_s3, 256 }
  0x8b   :  { %p68_p5 = scmp.ne.s32.totalorder %s128_s3, %s67_s22  ;;  %p71_p6 = scmp.lt.u32.totalorder %s67_s22, %s128_s3 }
  0x8d   :  { %p73_p7 = pnand %p71_p6, %p68_p5 }
  0x8f   :  { %76 = shalt.err (!%p73_p7)
}
  0x90   :  { %47 = dma.vmem_to_hbm [thread:$0]  %s45_s1, 256, %s128_s3, [#allocation3]  }
  0x91   :  { %77 = dma.done.wait [#allocation3], 256  }
  0x92   :  { %78 = vsyncadd [#allocation3], 4294967040 }
  0x93   :  { %51 = vsyncpa [#allocation3], 1 }

</bundles_post_ra>
